<compile_context>
chip_gen: v7x
topology: tpu7x:2x2x1
jax: 0.10.0
libtpu: 0.0.40
codegen_flags: <defaults>
</compile_context>

<pallas_src>
import functools

import jax
import jax.numpy as jnp
from jax.experimental import pallas as pl
from jax.experimental.pallas import tpu as pltpu

_LANE = 128


def _round_up(x, m):
    return (x + m - 1) // m * m


def _cdiv(a, b):
    return -(-a // b)


def _vmem_budgets():
    """Return (target_tile_bytes, vmem_limit_bytes), generation aware."""
    cap = 128 * 1024 * 1024
    try:
        info = pltpu.get_tpu_info()
        cap = int(getattr(info, "vmem_capacity_bytes", cap)) or cap
    except Exception:
        pass
    if cap <= 64 * 1024 * 1024:                 # v7x-class: 64 MiB physical VMEM
        return 4 * 1024 * 1024, 48 * 1024 * 1024
    return 4 * 1024 * 1024, 64 * 1024 * 1024    # v5e / v6e: 128 MiB physical


def _choose_s_tiling(C, S, itemsize, target_tile_bytes):
    """Pick a lane-dense (multiple-of-128) spatial tile with bounded VMEM.

    No padding of S: the last grid step may cover a partial tile.
    """
    max_s = max(_LANE,
                (target_tile_bytes // max(1, C * itemsize)) // _LANE * _LANE)
    tile_s = min(_round_up(S, _LANE), max_s)
    n_s = _cdiv(S, tile_s)
    tile_s = _round_up(_cdiv(S, n_s), _LANE)    # balance tiles across steps
    n_s = _cdiv(S, tile_s)
    return tile_s, n_s


# ----------------------------- kernels ---------------------------------------

def _pool_excite_kernel(x_ref, w1t_ref, w2t_ref, gate_ref, sum_ref, *,
                        S, tile_s, inv_s):
    # x_ref:    (1, C, tile_s) native dtype.
    # w1t_ref:  (C, Cr) f32 resident;  w2t_ref: (Cr, C) f32 resident.
    # gate_ref: (1, 1, C) native dtype, resident across the "arbitrary" S axis.
    # sum_ref:  (1, C) f32 running-sum scratch.
    s = pl.program_id(1)

    @pl.when(s == 0)
    def _():
        sum_ref[...] = jnp.zeros_like(sum_ref)

    # Mask lanes past the true spatial extent: the last tile may be partial
    # and its out-of-bounds region holds unspecified data.
    lane = jax.lax.broadcasted_iota(jnp.int32, x_ref.shape, 2)
    rem = S - s * tile_s
    xv = jnp.where(lane < rem, x_ref[...], 0)
    # f32 accumulation without materializing a full f32 copy of the tile.
    sum_ref[...] += jnp.sum(xv, axis=-1, dtype=jnp.float32)

    @pl.when(s == pl.num_programs(1) - 1)
    def _():
        pooled = sum_ref[...] * inv_s                                 # (1, C) f32
        h = jnp.maximum(
            jnp.dot(pooled, w1t_ref[...],
                    preferred_element_type=jnp.float32), 0.0)         # (1, Cr)
        g = jax.nn.sigmoid(
            jnp.dot(h, w2t_ref[...],
                    preferred_element_type=jnp.float32))              # (1, C)
        gate_ref[...] = g[:, None, :].astype(gate_ref.dtype)          # (1, 1, C)


def _scale_kernel(x_ref, gate_ref, o_ref):
    # x_ref/o_ref: (1, C, tile_s); gate_ref: (1, C, 1).  Native-dtype multiply.
    # Out-of-bounds lanes of the last partial tile are dropped on writeback.
    o_ref[...] = x_ref[...] * gate_ref[...]


# ----------------------------- wrapper ----------------------------------------

def se_block(x, w1, w2, *, target_tile_bytes=None):
    """x: (B, C, D, H, W); w1: (Cr, C); w2: (C, Cr).  Returns same shape as x."""
    B, C, D, H, W = x.shape
    S = D * H * W
    itemsize = jnp.dtype(x.dtype).itemsize
    Cr = w1.shape[0]

    tgt, vmem_limit = _vmem_budgets()
    if target_tile_bytes is None:
        target_tile_bytes = tgt
    tile_s, n_s = _choose_s_tiling(C, S, itemsize, target_tile_bytes)

    x3 = x.reshape(B, C, S)          # free reshape of a contiguous NCDHW array
    w1t = jnp.transpose(w1)          # (C, Cr)
    w2t = jnp.transpose(w2)          # (Cr, C)
    x_bytes = B * C * S * itemsize

    # ---- pass 1: pooled mean + excite MLP (fused), per-(b, c) gates ---------
    gates = pl.pallas_call(
        functools.partial(_pool_excite_kernel, S=S, tile_s=tile_s,
                          inv_s=1.0 / float(S)),
        out_shape=jax.ShapeDtypeStruct((B, 1, C), x.dtype),
        grid_spec=pltpu.PrefetchScalarGridSpec(
            num_scalar_prefetch=0,
            grid=(B, n_s),
            in_specs=[
                pl.BlockSpec((1, C, tile_s), lambda b, s: (b, 0, s)),
                pl.BlockSpec((C, Cr), lambda b, s: (0, 0)),
                pl.BlockSpec((Cr, C), lambda b, s: (0, 0)),
            ],
            out_specs=pl.BlockSpec((1, 1, C), lambda b, s: (b, 0, 0)),
            scratch_shapes=[pltpu.VMEM((1, C), jnp.float32)],
        ),
        compiler_params=pltpu.CompilerParams(
            dimension_semantics=("parallel", "arbitrary"),
            vmem_limit_bytes=vmem_limit),
        cost_estimate=pl.CostEstimate(
            flops=B * C * S + 2 * B * C * Cr,
            transcendentals=B * C,
            bytes_accessed=x_bytes + B * C * itemsize),
    )(x3, w1t, w2t)

    # Tiny (B*C elements) layout fix so the gate broadcasts per-channel.
    gates_col = gates.reshape(B, C, 1)

    # ---- pass 2: channel-wise rescale ----------------------------------------
    out = pl.pallas_call(
        _scale_kernel,
        out_shape=jax.ShapeDtypeStruct((B, C, S), x.dtype),
        grid_spec=pltpu.PrefetchScalarGridSpec(
            num_scalar_prefetch=0,
            grid=(B, n_s),
            in_specs=[
                pl.BlockSpec((1, C, tile_s), lambda b, s: (b, 0, s)),
                pl.BlockSpec((1, C, 1), lambda b, s: (b, 0, 0)),
            ],
            out_specs=pl.BlockSpec((1, C, tile_s), lambda b, s: (b, 0, s)),
        ),
        compiler_params=pltpu.CompilerParams(
            dimension_semantics=("parallel", "parallel"),
            vmem_limit_bytes=vmem_limit),
        cost_estimate=pl.CostEstimate(
            flops=B * C * S, transcendentals=0,
            bytes_accessed=2 * x_bytes + B * C * itemsize),
    )(x3, gates_col)

    return out.reshape(B, C, D, H, W)


# ----------------------------- reference & init -------------------------------

def _kaiming_normal_fan_out(key, out_ch, in_ch):
    # nn.init.kaiming_normal_(mode='fan_out', nonlinearity='relu') for a
    # 1x1x1 Conv3d weight (out_ch, in_ch, 1, 1, 1): fan_out = out_ch.
    std = (2.0 / out_ch) ** 0.5
    return std * jax.random.normal(key, (out_ch, in_ch), dtype=jnp.float32)


def se_block_ref(x, w1, w2):
    # Pure-JAX reference mirroring the PyTorch forward.
    y = jnp.mean(x, axis=(2, 3, 4))                    # (B, C)
    y = jnp.maximum(y @ w1.T, 0.0)                     # (B, Cr)
    y = jax.nn.sigmoid(y @ w2.T)                       # (B, C)
    return x * y[:, :, None, None, None]


if __name__ == "__main__":
    B, C, D, H, W = 2, 8, 8, 8, 8
    reduction = 4
    Cr = C // reduction

    key = jax.random.PRNGKey(0)
    kx, k1, k2, kx2, kx3 = jax.random.split(key, 5)
    x = jax.random.normal(kx, (B, C, D, H, W), dtype=jnp.float32)
    w1 = _kaiming_normal_fan_out(k1, Cr, C)            # Conv3d(C -> Cr, 1x1x1)
    w2 = _kaiming_normal_fan_out(k2, C, Cr)            # Conv3d(Cr -> C, 1x1x1)

    out = jax.block_until_ready(se_block(x, w1, w2))
    ref = se_block_ref(x, w1, w2)
    assert out.shape == x.shape
    assert jnp.allclose(out, ref, atol=1e-5, rtol=1e-5)

    # Non-128-multiple S (7*7*7 = 343): exercises the masked partial tile
    # (no wrapper-side padding / slicing anymore).
    x_odd = jax.random.normal(kx2, (1, C, 7, 7, 7), dtype=jnp.float32)
    out_odd = jax.block_until_ready(se_block(x_odd, w1, w2))
    assert jnp.allclose(out_odd, se_block_ref(x_odd, w1, w2),
                        atol=1e-5, rtol=1e-5)

    # Multi-tile reduction path: force tiny tiles so n_s > 1 with a ragged
    # last tile (S = 7*9*11 = 693, tile_s = 256 -> 3 steps, 181 valid lanes).
    x_multi = jax.random.normal(kx3, (1, C, 7, 9, 11), dtype=jnp.float32)
    out_multi = jax.block_until_ready(
        se_block(x_multi, w1, w2, target_tile_bytes=8 * 1024))
    assert jnp.allclose(out_multi, se_block_ref(x_multi, w1, w2),
                        atol=1e-5, rtol=1e-5)

    print("KERNEL_OK")
</pallas_src>

<mosaic_0001>
module attributes {stable_mosaic.version = 11 : i64} {
  func.func @_pool_excite_kernel(%arg0: i32, %arg1: i32, %arg2: memref<1x8x512xf32, #tpu.memory_space<vmem>>, %arg3: memref<8x2xf32, #tpu.memory_space<vmem>>, %arg4: memref<2x8xf32, #tpu.memory_space<vmem>>, %arg5: memref<1x1x8xf32, #tpu.memory_space<vmem>>, %arg6: memref<1x8xf32, #tpu.memory_space<vmem>>) attributes {dimension_semantics = [#tpu.dimension_semantics<parallel>, #tpu.dimension_semantics<arbitrary>], iteration_bounds = array<i64: 2, 1>, scalar_prefetch = 0 : i64, scratch_operands = 1 : i64, tpu.core_type = #tpu.core_type<tc>, window_params = [{transform_indices = @transform_0, window_bounds = array<i64: 1, 8, 512>}, {pipeline_mode = #tpu.pipeline_mode<synchronous>, transform_indices = @transform_1, window_bounds = array<i64: 8, 2>}, {pipeline_mode = #tpu.pipeline_mode<synchronous>, transform_indices = @transform_2, window_bounds = array<i64: 2, 8>}, {transform_indices = @transform_3, window_bounds = array<i64: 1, 1, 8>}]} {
    %c0_i32 = arith.constant 0 : i32
    %0 = arith.cmpi eq, %arg1, %c0_i32 : i32
    %1 = arith.extui %0 : i1 to i32
    %c0_i32_0 = arith.constant 0 : i32
    %2 = arith.cmpi ne, %1, %c0_i32_0 : i32
    scf.if %2 {
      %cst_11 = arith.constant 0.000000e+00 : f32
      %19 = vector.broadcast %cst_11 : f32 to vector<1x8xf32>
      %c0_12 = arith.constant 0 : index
      %c0_13 = arith.constant 0 : index
      %20 = vector.load %arg6[%c0_12, %c0_13] : memref<1x8xf32, #tpu.memory_space<vmem>>, vector<1x8xf32>
      tpu.vector_store %arg6[%c0_12, %c0_13], %19 {strides = array<i32>} : memref<1x8xf32, #tpu.memory_space<vmem>>, vector<1x8xf32>,
    } else {
    }
    %3 = tpu.iota {dimensions = array<i32: 2>} : vector<1x8x512xi32>
    %c512_i32 = arith.constant 512 : i32
    %4 = arith.muli %arg1, %c512_i32 : i32
    %c512_i32_1 = arith.constant 512 : i32
    %5 = arith.subi %c512_i32_1, %4 : i32
    %6 = vector.broadcast %5 : i32 to vector<1x8x512xi32>
    %7 = arith.cmpi slt, %3, %6 : vector<1x8x512xi32>
    %c0 = arith.constant 0 : index
    %c0_2 = arith.constant 0 : index
    %c0_3 = arith.constant 0 : index
    %8 = vector.load %arg2[%c0, %c0_2, %c0_3] : memref<1x8x512xf32, #tpu.memory_space<vmem>>, vector<1x8x512xf32>
    %c0_i32_4 = arith.constant 0 : i32
    %9 = arith.sitofp %c0_i32_4 : i32 to f32
    %10 = vector.broadcast %9 : f32 to vector<1x8x512xf32>
    %11 = arith.select %7, %8, %10 : vector<1x8x512xi1>, vector<1x8x512xf32>
    %c0_5 = arith.constant 0 : index
    %c0_6 = arith.constant 0 : index
    %12 = vector.load %arg6[%c0_5, %c0_6] : memref<1x8xf32, #tpu.memory_space<vmem>>, vector<1x8xf32>
    %cst = arith.constant dense<0.000000e+00> : vector<1x8xf32>
    %13 = vector.multi_reduction <add>, %11, %cst [2] : vector<1x8x512xf32> to vector<1x8xf32>
    %14 = arith.addf %12, %13 : vector<1x8xf32>
    %c0_7 = arith.constant 0 : index
    %c0_8 = arith.constant 0 : index
    %15 = vector.load %arg6[%c0_7, %c0_8] : memref<1x8xf32, #tpu.memory_space<vmem>>, vector<1x8xf32>
    tpu.vector_store %arg6[%c0_7, %c0_8], %14 {strides = array<i32>} : memref<1x8xf32, #tpu.memory_space<vmem>>, vector<1x8xf32>,
    %c0_i32_9 = arith.constant 0 : i32
    %16 = arith.cmpi eq, %arg1, %c0_i32_9 : i32
    %17 = arith.extui %16 : i1 to i32
    %c0_i32_10 = arith.constant 0 : i32
    %18 = arith.cmpi ne, %17, %c0_i32_10 : i32
    scf.if %18 {
      %c0_11 = arith.constant 0 : index
      %c0_12 = arith.constant 0 : index
      %19 = vector.load %arg6[%c0_11, %c0_12] : memref<1x8xf32, #tpu.memory_space<vmem>>, vector<1x8xf32>
      %cst_13 = arith.constant 0.001953125 : f32
      %20 = vector.broadcast %cst_13 : f32 to vector<1x8xf32>
      %21 = arith.mulf %19, %20 : vector<1x8xf32>
      %c0_14 = arith.constant 0 : index
      %c0_15 = arith.constant 0 : index
      %22 = vector.load %arg3[%c0_14, %c0_15] : memref<8x2xf32, #tpu.memory_space<vmem>>, vector<8x2xf32>
      %cst_16 = arith.constant dense<0.000000e+00> : vector<1x2xf32>
      %23 = tpu.matmul %21, %22, %cst_16 {dimension_numbers = #tpu.dot_dimension_numbers<[1], [0], [0], [1], [0, 0, 1, 1], [], []>} : vector<1x8xf32>, vector<8x2xf32>, vector<1x2xf32> -> vector<1x2xf32>
      %cst_17 = arith.constant 0.000000e+00 : f32
      %24 = vector.broadcast %cst_17 : f32 to vector<1x2xf32>
      %25 = arith.maximumf %23, %24 : vector<1x2xf32>
      %c0_18 = arith.constant 0 : index
      %c0_19 = arith.constant 0 : index
      %26 = vector.load %arg4[%c0_18, %c0_19] : memref<2x8xf32, #tpu.memory_space<vmem>>, vector<2x8xf32>
      %cst_20 = arith.constant dense<0.000000e+00> : vector<1x8xf32>
      %27 = tpu.matmul %25, %26, %cst_20 {dimension_numbers = #tpu.dot_dimension_numbers<[1], [0], [0], [1], [0, 0, 1, 1], [], []>} : vector<1x2xf32>, vector<2x8xf32>, vector<1x8xf32> -> vector<1x8xf32>
      %28 = arith.negf %27 : vector<1x8xf32>
      %29 = math.exp %28 : vector<1x8xf32>
      %cst_21 = arith.constant 1.000000e+00 : f32
      %30 = vector.broadcast %cst_21 : f32 to vector<1x8xf32>
      %31 = arith.addf %30, %29 : vector<1x8xf32>
      %32 = arith.divf %30, %31 : vector<1x8xf32>
      %33 = vector.shape_cast %32 : vector<1x8xf32> to vector<1x1x8xf32>
      %c0_22 = arith.constant 0 : index
      %c0_23 = arith.constant 0 : index
      %c0_24 = arith.constant 0 : index
      %34 = vector.load %arg5[%c0_22, %c0_23, %c0_24] : memref<1x1x8xf32, #tpu.memory_space<vmem>>, vector<1x1x8xf32>
      tpu.vector_store %arg5[%c0_22, %c0_23, %c0_24], %33 {strides = array<i32>} : memref<1x1x8xf32, #tpu.memory_space<vmem>>, vector<1x1x8xf32>,
    } else {
    }
    return
  }
  func.func @transform_0(%arg0: i32, %arg1: i32) -> (i32, i32, i32) {
    %c0_i32 = arith.constant 0 : i32
    %c0_i32_0 = arith.constant 0 : i32
    return %arg0, %c0_i32, %arg1 : i32, i32, i32
  }
  func.func @transform_1(%arg0: i32, %arg1: i32) -> (i32, i32) {
    %c0_i32 = arith.constant 0 : i32
    %c0_i32_0 = arith.constant 0 : i32
    %c0_i32_1 = arith.constant 0 : i32
    return %c0_i32, %c0_i32_0 : i32, i32
  }
  func.func @transform_2(%arg0: i32, %arg1: i32) -> (i32, i32) {
    %c0_i32 = arith.constant 0 : i32
    %c0_i32_0 = arith.constant 0 : i32
    %c0_i32_1 = arith.constant 0 : i32
    return %c0_i32, %c0_i32_0 : i32, i32
  }
  func.func @transform_3(%arg0: i32, %arg1: i32) -> (i32, i32, i32) {
    %c0_i32 = arith.constant 0 : i32
    %c0_i32_0 = arith.constant 0 : i32
    %c0_i32_1 = arith.constant 0 : i32
    return %arg0, %c0_i32, %c0_i32_0 : i32, i32, i32
  }
}

</mosaic_0001>

<bundles_post_ra>
// kernel: tpu_custom_call.1
= control target key start
LH: loop header
LB: loop body
LE: loop exit
PB: predicated region body
PF: predicated region fallthrough
CT: control target
= control target key end

     0   :  { %8 = vsyncpa [#allocation4], 0  ;;  %s1219_s0 = inlined_call_operand.hbm [shape: f32[2,8,512], index: 0, kind: input, shape index: {}]   ;;  %s1220_s1 = inlined_call_operand.hbm [shape: f32[8,2], index: 1, kind: input, shape index: {}]   ;;  %s1221_s2 = inlined_call_operand.hbm [shape: f32[2,8], index: 2, kind: input, shape index: {}]   ;;  %s1222_s3 = inlined_call_operand.hbm [shape: f32[2,1,8], index: 3, kind: output, shape index: {}]  }
   0x1   :  { %10 = vsyncpa [#allocation4 + $0x1], 0 }
   0x2   :  { %11 = vsyncpa [#allocation7], 0 }
   0x3   :  { %12 = vsyncpa [#allocation5], 0 }
   0x4   :  { %14 = vsyncpa [#allocation5 + $0x1], 0  ;;  %s972_s12 = smov 0   ;;  %s974_s13 = smov 0  }
   0x5   :  { %s976_s14 = smov 0   ;;  %s978_s15 = smov 0  }
   0x6   :  { %s980_s16 = smov 0   ;;  %s982_s17 = smov 0  }
   0x7 LB: > { %s643_s18 = sadd.s32 4294967295, %s942_s17   ;;  %s644_s19 = sadd.s32 4294967294, %s942_s17   ;;  %s942_s17 = sphi %s982_s17, %s20_s17   ;;  %s938_s16 = sphi %s980_s16, %s1245_s16   ;;  %s934_s15 = sphi %s978_s15, %s1244_s15   ;;  %s930_s14 = sphi %s976_s14, %s1243_s14   ;;  %s926_s13 = sphi %s974_s13, %s1242_s13   ;;  %s922_s12 = sphi %s972_s12, %s1241_s12  }
   0x8   : > { %p54_p0 = scmp.ne.s32.totalorder %s926_s13, %s922_s12  ;;  %p1006_p1 = scmp.eq.s32.totalorder %s643_s18, 0 }
   0x9   : > { %p1010_p2 = scmp.eq.s32.totalorder %s643_s18, 1  ;;  %p126_p3 = scmp.eq.s32.totalorder %s644_s19, 1 }
   0xa   : > { %s1227_s20 = scalar_select %p1006_p1, 1, 0 }
   0xb   : > { %s1228_s21 = scalar_select %p1010_p2, 1, 0 }
   0xc   : > { %p1016_p4 = por %p1006_p1, %p54_p0  ;;  %p645_p5 = scmp.ge.s32.totalorder %s942_s17, 1 }
   0xd   : > { %p1021_p6 = por %p126_p3, %p54_p0  ;;  %p133_p7 = scmp.lt.s32.totalorder %s942_s17, 3 }
   0xe   : > { %s1229_s22 = scalar_select %p1016_p4, 1, 0 }
   0xf   : > { %s1230_s23 = scalar_select %p1021_p6, 1, 0 }
  0x10   : > { %p1026_p8 = pnand %p645_p5, %p133_p7  ;;  %s944_s25 = smov [#allocation6]  }
  0x11   : > { %s146_s26 = sshll.u32 %s944_s25, 4  ;;  %s945_s27 = smov [#allocation8]   ;;  %s147_s26 = int_to_ptr.vmem [resolvable:$true] %s146_s26 }
  0x12   : > { %s1231_s24 = scalar_select %p1026_p8, 1, 0 }
  0x13   : > { %p690_p10 = pneg %p1026_p8  ;;  %s157_s28 = sshll.u32 %s945_s27, 4  ;;  %s1039_s28 = int_to_ptr.vmem [resolvable:$true] %s157_s28 }
  0x14   : > { %s770_s5 = scalar_lea.hbm %s1220_s1, 128 }
  0x15   : > { %p1035_p11 = pnand %p690_p10, %p1006_p1  ;;  %p771_p12 = scmp.ne.s32.totalorder %s1220_s1, %s770_s5 }
  0x16   : > { %p777_p5 = scmp.lt.u32.totalorder %s770_s5, %s1220_s1 }
  0x17   : > { %p772_p13 = pneg %p1035_p11 }
  0x19   : > { %p773_p0 = pnand %p772_p13, %p771_p12 }
  0x1b   : > { %p774_p3 = pneg %p773_p0 }
  0x1d   : > { %p779_p7 = pnand %p777_p5, %p774_p3 }
  0x1f   : > { %782 = shalt.err (!%p779_p7)
}
  0x20   : > { %s783_s10 = scalar_lea.vmem %s147_s26, 128  ;;  %p791_p1 = scmp.lt.s32.totalorder %s147_s26, %s147_s26 }
  0x21   : > { %p784_p10 = scmp.ne.s32.totalorder %s147_s26, %s783_s10  ;;  %p792_p4 = scmp.lt.s32.totalorder %s783_s10, %s783_s10 }
  0x23   : > { %p786_p9 = pnand %p784_p10, %p772_p13  ;;  %p793_p8 = por %p792_p4, %p791_p1 }
  0x25   : > { %p787_p6 = pneg %p786_p9 }
  0x27   : > { %p794_p2 = pnand %p793_p8, %p787_p6 }
  0x29   : > { %797 = shalt.err (!%p794_p2)
}
  0x2a   : > { %693 = dma.hbm_to_vmem [thread:$0]  (!%p1035_p11), %s1220_s1, 128, %s147_s26, [#allocation7]  }
  0x2b   : > { %s798_s27 = scalar_lea.hbm %s1221_s2, 32 }
  0x2c   : > { %p799_p9 = scmp.ne.s32.totalorder %s1221_s2, %s798_s27  ;;  %p805_p2 = scmp.lt.u32.totalorder %s798_s27, %s1221_s2 }
  0x2e   : > { %p801_p1 = pnand %p799_p9, %p772_p13 }
  0x30   : > { %p802_p4 = pneg %p801_p1 }
  0x32   : > { %p807_p6 = pnand %p805_p2, %p802_p4 }
  0x34   : > { %810 = shalt.err (!%p807_p6)
}
  0x35   : > { %s811_s26 = scalar_lea.vmem %s1039_s28, 32  ;;  %p819_p3 = scmp.lt.s32.totalorder %s1039_s28, %s1039_s28 }
  0x36   : > { %p812_p8 = scmp.ne.s32.totalorder %s1039_s28, %s811_s26  ;;  %p820_p5 = scmp.lt.s32.totalorder %s811_s26, %s811_s26 }
  0x38   : > { %p814_p12 = pnand %p812_p8, %p772_p13  ;;  %p821_p7 = por %p820_p5, %p819_p3 }
  0x3a   : > { %p815_p0 = pneg %p814_p12 }
  0x3c   : > { %p822_p10 = pnand %p821_p7, %p815_p0 }
  0x3e   : > { %825 = shalt.err (!%p822_p10)
}
  0x3f   : > { %696 = dma.hbm_to_vmem [thread:$0]  (!%p1035_p11), %s1221_s2, 32, %s1039_s28, [#allocation7]  }
  0x40   : > { %s32_s9 = sadd.s32 1, %s938_s16  ;;  %s41_s10 = sadd.s32 1, %s930_s14 }
  0x41   : > { %p34_p13 = scmp.ge.s32.totalorder %s32_s9, 2  ;;  %p48_p9 = scmp.ne.s32.totalorder %s930_s14, %s926_s13 }
  0x42   : > { %p49_p1 = scmp.eq.s32.totalorder %s942_s17, 0  ;;  %p707_p4 = scmp.lt.s32.totalorder %s942_s17, 2 }
  0x43   : > { %s1247_s9 = smov (%p34_p13, %s32_s9), 0  ;;  %p1233_p6 = scmp.ne.s32.totalorder %s1228_s21, 0 }
  0x44   : > { %p50_p2 = por %p49_p1, %p48_p9  ;;  %s36_s11 = ssub.s32 %s938_s16, %s1247_s9 }
  0x45   : > { %p1098_p8 = por %p1233_p6, %p48_p9  ;;  %s168_s18 = sand.u32 1, %s930_s14  }
  0x46   : > { %p39_p12 = scmp.eq.s32.totalorder %s36_s11, 0  ;;  %s649_s28 = sshll.u32 %s168_s18, 5 }
  0x47   : > { %s663_s19 = sshll.u32 %s938_s16, 9  ;;  %s172_s21 = scalar_lea.vmem [#allocation3], %s649_s28 }
  0x48   : > { %s1107_s25 = scalar_select %p39_p12, %s930_s14, %s41_s10  }
  0x49   : > { %s1112_s4 = scalar_lea.hbm %s1219_s0, %s663_s19  ;;  %s182_s5 = sshll.u32 %s172_s21, 4  ;;  %s1120_s5 = int_to_ptr.vmem [resolvable:$true] %s182_s5 }
  0x4a   : > { %p1116_p11 = pnand %p707_p4, %p50_p2  ;;  %s169_s26 = scalar_lea.sflag [#allocation4], %s168_s18 }
  0x4b   : > { %s826_s7 = scalar_lea.hbm %s1112_s4, 512  ;;  %s831_s11 = scalar_lea.hbm %s1219_s0, 1024 }
  0x4c   : > { %p827_p0 = scmp.ne.s32.totalorder %s1112_s4, %s826_s7  ;;  %p828_p3 = pneg %p1116_p11 }
  0x4d   : > { %p832_p10 = scmp.lt.u32.totalorder %s1112_s4, %s1219_s0  ;;  %p833_p13 = scmp.lt.u32.totalorder %s831_s11, %s826_s7 }
  0x4e   : > { %p829_p5 = pnand %p828_p3, %p827_p0  ;;  %p835_p1 = scmp.lt.u32.totalorder %s826_s7, %s1112_s4 }
  0x4f   : > { %p834_p9 = por %p833_p13, %p832_p10 }
  0x50   : > { %p830_p7 = pneg %p829_p5 }
  0x51   : > { %p836_p4 = por %p835_p1, %p834_p9 }
  0x53   : > { %p837_p2 = pnand %p836_p4, %p830_p7 }
  0x55   : > { %840 = shalt.err (!%p837_p2)
}
  0x56   : > { %s841_s18 = scalar_lea.vmem %s1120_s5, 512  ;;  %s946_s27 = smov [#allocation3]  }
  0x57   : > { %p842_p6 = scmp.ne.s32.totalorder %s1120_s5, %s841_s18  ;;  %s846_s30 = sshll.u32 %s946_s27, 4  ;;  %s847_s30 = int_to_ptr.vmem [resolvable:$false] %s846_s30 }
  0x58   : > { %s848_s21 = scalar_lea.vmem %s847_s30, 1024  ;;  %p849_p5 = scmp.lt.s32.totalorder %s1120_s5, %s847_s30 }
  0x59   : > { %p844_p12 = pnand %p842_p6, %p828_p3  ;;  %p850_p10 = scmp.lt.s32.totalorder %s848_s21, %s841_s18 }
  0x5b   : > { %p845_p0 = pneg %p844_p12  ;;  %p851_p13 = por %p850_p10, %p849_p5 }
  0x5d   : > { %p852_p9 = pnand %p851_p13, %p845_p0 }
  0x5f   : > { %855 = shalt.err (!%p852_p9)
}
  0x60   : > { %700 = dma.hbm_to_vmem [thread:$0]  (!%p1116_p11), %s1112_s4, 512, %s1120_s5, %s169_s26  }
  0x61   : > { %p1236_p7 = scmp.ne.s32.totalorder %s1231_s24, 0 }
  0x62   : > { %s1150_s7 = sand.u32 (!%p1236_p7), 1, %s926_s13   ;;  %p1237_p3 = scmp.ne.s32.totalorder (!%p1236_p7), %s1229_s22, 0 }
  0x63   : > { %191 = sbr.rel (%p1236_p7) target bundleno = 884 (0x374), region = 32  ;;  %s653_s8 = sshll.u32 (!%p1236_p7), %s1150_s7, 5 }
  0x64   : > { %s194_s10 = scalar_lea.sflag (!%p1236_p7), [#allocation4], %s1150_s7  ;;  %s197_s11 = scalar_lea.vmem (!%p1236_p7), [#allocation3], %s653_s8 }
  0x6a   : > { %909 = dma.done.wait (%p1237_p3), %s194_s10, 512  }
  0x6b   : > { %911 = vsyncadd (%p1237_p3), %s194_s10, 4294966784  ;;  %p1238_p1 = scmp.ne.s32.totalorder %s1227_s20, 0 }
  0x6d   : > { %913 = dma.done.wait (%p1238_p1), [#allocation7], 160  }
  0x6e   : > { %915 = vsyncadd (%p1238_p1), [#allocation7], 4294967136  ;;  %v246_v0 = vld [vmem:[%s197_s11] sm:$0xff]  ;;  %v247_v1 = vld [vmem:[%s197_s11 + $0x8] sm:$0xff]  ;;  %v947_v7 = vmov 0   ;;  %v234_v8 = vlaneseq  ;;  %vm232_vm0 = vcmask 57344  }
  0x6f   : > { %v248_v2 = vld [vmem:[%s197_s11 + $0x10] sm:$0xff]  ;;  %v255_v3 = vadd.f32 %v247_v1, %v246_v0  ;;  %v249_v4 = vld [vmem:[%s197_s11 + $0x18] sm:$0xff]  ;;  %765 = vset.pattern.permute.xlu0 %v947_v7  ;;  %v948_v12 = vmov 1966171168   ;;  %v949_v46 = vmov 0.0   ;;  %v372_v47 = vld [vmem:[#allocation6] sm:$0xff] }
  0x70   : > { %v262_v9 = vshrl.u32 %v234_v8, 7  ;;  %v235_v10 = vand.u32 127, %v234_v8  ;;  %v298_v13 = vunpack.c.l.s4 %v948_v12  ;;  %233 = vst.msk [vmem:[#allocation2] sm:$0x1] %vm232_vm0, %v949_v46  ;;  %668 = vmatprep.subr.mxu0 %v949_v46  ;;  %673 = vmatprep.subr.mxu1 %v949_v46  ;;  %vm950_vm1 = vmmov 0   ;;  %s660_s20 = sshll.u32 %s934_s15, 4 }
  0x71   : > { %v256_v5 = vadd.f32 %v255_v3, %v248_v2  ;;  %669 = vmatpush3.msra.mxu0 %v372_v47  ;;  %670 = vmatprep.mubr.msk.f32.mxu0 %vm950_vm1, %v949_v46  ;;  %vm373_vm2 = vcmask 64512   ;;  %v448_v56 = vld [vmem:[#allocation8] sm:$0x3]  ;;  %vm453_vm3 = vcmask 1041408   ;;  %vm449_vm4 = vcmask 15360   ;;  %s226_s22 = scalar_lea.vmem [#allocation9], %s1150_s7  ;;  %s1169_s6 = scalar_lea.hbm %s1222_s3, %s660_s20 }
  0x72   : > { %v347_v11 = vsub.s32 %v235_v10, %v262_v9  ;;  %v299_v14 = vunpack.c.0.s8 %v298_v13  ;;  %v263_v15 = vsub.s32 0, %v262_v9  ;;  %v267_v16 = vsub.s32 1, %v262_v9  ;;  %675 = vmatprep.mubr.msk.f32.mxu1 %vm950_vm1, %v949_v46  ;;  %674 = vmatpush3.msk.msra.mxu1 %vm453_vm3, %v448_v56  ;;  %s547_s24 = sshll.u32 %s226_s22, 4  ;;  %s535_s26 = scalar_lea.sflag [#allocation5], %s1150_s7  ;;  %s1171_s24 = int_to_ptr.vmem [resolvable:$true] %s547_s24 }
  0x73   : > { %v257_v6 = vadd.f32 %v256_v5, %v249_v4  ;;  %v271_v17 = vsub.s32 2, %v262_v9  ;;  %v275_v18 = vsub.s32 3, %v262_v9  ;;  %v279_v19 = vsub.s32 4, %v262_v9  ;;  %s856_s28 = scalar_lea.vmem %s1171_s24, 16  ;;  %s951_s15 = smov [#allocation9]  }
  0x74   : > { %v283_v20 = vsub.s32 5, %v262_v9  ;;  %v287_v21 = vsub.s32 6, %v262_v9  ;;  %v291_v22 = vsub.s32 7, %v262_v9  ;;  %v302_v24 = vsub.s32 %v299_v14, %v262_v9  ;;  %p857_p11 = scmp.ne.s32.totalorder %s1171_s24, %s856_s28  ;;  %s860_s19 = sshll.u32 %s951_s15, 4  ;;  %s861_s19 = int_to_ptr.vmem [resolvable:$false] %s860_s19 }
  0x75   : > { %258 = vadd.xlane.f32.xlu0 %v257_v6  ;;  %s862_s18 = scalar_lea.vmem %s861_s19, 32  ;;  %p863_p6 = scmp.lt.s32.totalorder %s1171_s24, %s861_s19 }
  0x76   : > { %p858_p4 = pnand %p857_p11, %p1098_p8  ;;  %p864_p12 = scmp.lt.s32.totalorder %s862_s18, %s856_s28 }
  0x77   : > { %v254_v51 = vld [vmem:[#allocation2] sm:$0x1] }
  0x78   : > { %p859_p2 = pneg %p858_p4  ;;  %p865_p0 = por %p864_p12, %p863_p6 }
  0x7a   : > { %p866_p5 = pnand %p865_p0, %p859_p2 }
 0x102   : > { %v259_v23 = vpop.xlane.xlu0 %258 }
 0x103   : > { %v264_v25 = vrot.slane %v259_v23, %v263_v15  ;;  %v268_v26 = vrot.slane %v259_v23, %v267_v16  ;;  %v272_v27 = vrot.slane %v259_v23, %v271_v17  ;;  %v276_v28 = vrot.slane %v259_v23, %v275_v18 }
 0x104   : > { %v280_v29 = vrot.slane %v259_v23, %v279_v19  ;;  %v284_v30 = vrot.slane %v259_v23, %v283_v20  ;;  %v288_v31 = vrot.slane %v259_v23, %v287_v21  ;;  %v292_v32 = vrot.slane %v259_v23, %v291_v22 }
 0x105   : > { %v293_v33 = vcombine.low %v264_v25, %v268_v26  ;;  %v294_v34 = vcombine.low %v272_v27, %v276_v28 }
 0x106   : > { %v295_v35 = vcombine.low %v280_v29, %v284_v30  ;;  %v296_v36 = vcombine.low %v288_v31, %v292_v32 }
 0x107   : > { %v303_v37 = vrot.slane %v293_v33, %v302_v24  ;;  %v310_v38 = vrot.slane %v294_v34, %v302_v24 }
 0x108   : > { %v317_v39 = vrot.slane %v295_v35, %v302_v24  ;;  %v324_v40 = vrot.slane %v296_v36, %v302_v24 }
 0x109   : > { %v325_v41 = vcombine.low %v303_v37, %v310_v38 }
 0x10a   : > { %v326_v42 = vcombine.low %v317_v39, %v324_v40 }
 0x10b   : > { %v333_v43 = vrot.slane %v325_v41, %v302_v24 }
 0x10c   : > { %v340_v44 = vrot.slane %v326_v42, %v302_v24 }
 0x10e   : > { %v341_v45 = vcombine.low %v333_v43, %v340_v44 }
 0x110   : > { %343 = vperm.xlu0 %765, %v341_v45  }
 0x18f   : > { %v344_v48 = vpop.permute.xlu0 %343 }
 0x190   : > { %v348_v49 = vrot.slane %v344_v48, %v347_v11 }
 0x192   : > { %v355_v50 = vrot.slane %v348_v49, %v302_v24 }
 0x194   : > { %v362_v52 = vrot.slane %v355_v50, %v302_v24 }
 0x196   : > { %v364_v53 = vadd.f32 %v362_v52, %v254_v51 }
 0x198   : > { %366 = vst.msk [vmem:[#allocation2] sm:$0x1] %vm232_vm0, %v364_v53 }
 0x19f   : > { %v370_v54 = vld [vmem:[#allocation2] sm:$0x1] }
 0x1a0   : > { %v371_v55 = vmul.f32 0.001953125, %v370_v54 }
 0x1a2   : > { %671 = vmatmul.mubr.msk.f32.vlgmr.msra.gmra.mrb[0].mxu0 %vm373_vm2, %v371_v55 }
 0x275   : > { %v443_v57 = vpop.f32.mrb[0].mxu0 }
 0x276   : > { %v447_v58 = vmax.f32 %v443_v57, 0.0  ;;  %v672_v59 = vpop.f32.mrb[1].mxu0 }
 0x278   : > { %676 = vmatmul.mubr.msk.f32.vlgmr.msra.gmra.mrb[0].mxu1 %vm449_vm4, %v447_v58 }
 0x34b   : > { %v523_v60 = vpop.f32.mrb[0].mxu1 }
 0x34c   : > { %v659_v61 = vmul.f32 -1.442695, %v523_v60  ;;  %v677_v62 = vpop.f32.mrb[1].mxu1 }
 0x34e   : > { %766 = vpow2.f32 %v659_v61 }
 0x358   : > { %v767_v63 = vpop.eup %766 }
 0x359   : > { %v530_v0 = vadd.f32 1.0, %v767_v63 }
 0x35b   : > { %768 = vrcp.f32 %v530_v0 }
 0x365   : > { %v769_v1 = vpop.eup %768 }
 0x366   : > { %533 = vst.msk [vmem:[%s226_s22] sm:$0x1] %vm232_vm0, %v769_v1 }
 0x367   : > { %869 = shalt.err (!%p866_p5)
}
 0x368   : > { %s870_s27 = scalar_lea.hbm %s1169_s6, 16  ;;  %s874_s7 = scalar_lea.hbm %s1222_s3, 32 }
 0x369   : > { %p871_p10 = scmp.ne.s32.totalorder %s1169_s6, %s870_s27  ;;  %p875_p7 = scmp.lt.u32.totalorder %s1169_s6, %s1222_s3 }
 0x36a   : > { %p876_p3 = scmp.lt.u32.totalorder %s874_s7, %s870_s27  ;;  %p878_p11 = scmp.lt.u32.totalorder %s870_s27, %s1169_s6 }
 0x36b   : > { %p872_p13 = pnand %p871_p10, %p1098_p8 }
 0x36c   : > { %p877_p1 = por %p876_p3, %p875_p7 }
 0x36d   : > { %p873_p9 = pneg %p872_p13 }
 0x36e   : > { %p879_p4 = por %p878_p11, %p877_p1 }
 0x370   : > { %p880_p2 = pnand %p879_p4, %p873_p9 }
 0x372   : > { %883 = shalt.err (!%p880_p2)
}
 0x373   : > { %688 = dma.vmem_to_hbm [thread:$0]  (%p1098_p8), %s1171_s24, 16, %s1169_s6, %s535_s26  }
 0x374 PF: > { %s559_s11 = sand.u32 1, %s922_s12   ;;  %p1239_p6 = scmp.ne.s32.totalorder %s1230_s23, 0 }
 0x375   : > { %p1240_p12 = scmp.ge.s32.totalorder %s942_s17, 2  ;;  %s560_s20 = scalar_lea.sflag [#allocation5], %s559_s11 }
 0x377   : > { %p702_p0 = pnand %p1240_p12, %p1239_p6 }
 0x379   : > { %917 = dma.done.wait (!%p702_p0), %s560_s20, 16  }
 0x37a   : > { %919 = vsyncadd (!%p702_p0), %s560_s20, 4294967280  ;;  %s20_s17 = sadd.s32 1, %s942_s17   ;;  %s1241_s12 = smov %s926_s13 }
 0x37b   : > { %p17_p5 = scmp.ge.s32.totalorder %s20_s17, 4   ;;  %s1242_s13 = smov %s930_s14 }
 0x37c   : > { %s1243_s14 = smov %s1107_s25  ;;  %s1244_s15 = smov %s938_s16 }
 0x37d   : > { %s1245_s16 = smov %s1247_s9  ;;  %19 = sbr.rel (!%p17_p5) target bundleno = 7 (0x7), region = 93 }
 0x384   :  { %564 = vsyncpa [#allocation4], 1 }
 0x385   :  { %566 = vsyncpa [#allocation4 + $0x1], 1 }
 0x386   :  { %567 = vsyncpa [#allocation7], 1 }
 0x387   :  { %568 = vsyncpa [#allocation5], 1 }
 0x388   :  { %570 = vsyncpa [#allocation5 + $0x1], 1 }

</bundles_post_ra>
